<compile_context>
chip_gen: v7x
topology: tpu7x:2x2x1
jax: 0.10.0
libtpu: 0.0.40
codegen_flags: <defaults>
</compile_context>

<pallas_src>
import functools

import jax
import jax.numpy as jnp
from jax.experimental import pallas as pl
from jax.experimental.pallas import tpu as pltpu

_LANE = 128
_SUBLANE = 8


def _round_up(x, m):
    return ((x + m - 1) // m) * m


def _resident_spec(shape):
    """Grid-invariant block: constant index_map, single-buffered (stays in VMEM)."""
    try:
        return pl.BlockSpec(shape, lambda i: (0, 0), pipeline_mode=pl.Buffered(1))
    except TypeError:  # older BlockSpec without pipeline_mode kwarg
        return pl.BlockSpec(shape, lambda i: (0, 0))


def actor_kernel(x_ref, w1_ref, b1_ref, w2_ref, b2_ref,
                 w3_ref, b3_ref, w4_ref, b4_ref, o_ref):
    wd = w1_ref.dtype  # MXU input dtype (bf16 or f32); x_ref already arrives in wd
    # layer 1: Linear + ReLU   (MXU in wd, accumulate f32, elementwise f32)
    h = jnp.dot(x_ref[...], w1_ref[...], preferred_element_type=jnp.float32)
    h = jnp.maximum(h + b1_ref[...], 0.0)
    # layer 2: Linear + ReLU
    h = jnp.dot(h.astype(wd), w2_ref[...], preferred_element_type=jnp.float32)
    h = jnp.maximum(h + b2_ref[...], 0.0)
    # layer 3: Linear + ReLU
    h = jnp.dot(h.astype(wd), w3_ref[...], preferred_element_type=jnp.float32)
    h = jnp.maximum(h + b3_ref[...], 0.0)
    # layer 4: Linear + Tanh
    h = jnp.dot(h.astype(wd), w4_ref[...], preferred_element_type=jnp.float32)
    o_ref[...] = jnp.tanh(h + b4_ref[...]).astype(o_ref.dtype)


def prepare_actor_params(params, compute_dtype=jnp.bfloat16):
    """One-time pad + cast of the Actor weights (call OUTSIDE the hot loop).

    params: list of 4 (W, b) with W (in_features, out_features), b (1, out_features)
            (semantically identical to PyTorch F.linear with W^T).
    Returns (padded_params, action_dim): each layer's output dim zero-padded to a
    multiple of 128 (exact: padded rows/cols contribute nothing), W in
    `compute_dtype`, b in f32.
    """
    state_dim = params[0][0].shape[0]
    action_dim = params[-1][0].shape[1]
    out_dims = [w.shape[1] for w, _ in params]
    pad_dims = [state_dim] + [_round_up(d, _LANE) for d in out_dims]

    padded = []
    for i, (w, b) in enumerate(params):
        in_p, out_p = pad_dims[i], pad_dims[i + 1]
        wp = jnp.zeros((in_p, out_p), compute_dtype)
        wp = wp.at[: w.shape[0], : w.shape[1]].set(w.astype(compute_dtype))
        bp = jnp.zeros((1, out_p), jnp.float32)
        bp = bp.at[:, : b.shape[1]].set(b.astype(jnp.float32))
        padded.append((wp, bp))
    return tuple(padded), action_dim


@functools.partial(jax.jit, static_argnames=("action_dim", "block_b"))
def actor_forward(state, padded_params, *, action_dim, block_b=1024):
    """Fused Actor MLP forward on pre-padded params.

    state:         (B, state_dim) f32
    padded_params: output of prepare_actor_params
    """
    B, state_dim = state.shape
    compute_dtype = padded_params[0][0].dtype
    assert padded_params[0][0].shape[0] == state_dim
    pad_dims = [state_dim] + [w.shape[1] for w, _ in padded_params]
    out_pad = pad_dims[-1]

    # ---- batch tile: >=2 grid steps when B>8 (v7x megacore), minimal padding,
    # ---- large tiles to amortize per-step overhead. ----
    min_tiles = 2 if B > _SUBLANE else 1
    num_tiles = max(min_tiles, pl.cdiv(B, block_b))
    bt = _round_up(pl.cdiv(B, num_tiles), _SUBLANE)
    num_tiles = max(pl.cdiv(B, bt), 1)
    b_pad = bt * num_tiles

    # cast the streamed input ONCE (halves x DMA vs casting per tile in-kernel)
    x = state.astype(compute_dtype)
    if b_pad != B:
        x = jnp.pad(x, ((0, b_pad - B), (0, 0)))

    flat_args = [x]
    in_specs = [pl.BlockSpec((bt, state_dim), lambda i: (i, 0))]
    for w, b in padded_params:
        flat_args += [w, b]
        in_specs.append(_resident_spec(w.shape))
        in_specs.append(_resident_spec(b.shape))

    # ---- explicit VMEM budget (prevents silent spills; valid on v5e/v6e/v7x) ----
    itemsize = jnp.dtype(compute_dtype).itemsize
    w_bytes = sum(w.size * w.dtype.itemsize + b.size * b.dtype.itemsize
                  for w, b in padded_params)                       # Buffered(1): 1x
    x_bytes = 2 * bt * state_dim * itemsize                        # double-buffered
    o_bytes = 2 * bt * out_pad * 4                                 # double-buffered
    act_bytes = bt * sum(pad_dims[1:]) * (4 + itemsize)            # f32 h + cast copy
    vmem_limit = int(1.5 * (w_bytes + x_bytes + o_bytes + act_bytes)) + (2 << 20)
    vmem_limit = min(64 << 20, max(32 << 20, vmem_limit))

    out = pl.pallas_call(
        actor_kernel,
        out_shape=jax.ShapeDtypeStruct((b_pad, out_pad), jnp.float32),
        grid=(num_tiles,),
        in_specs=in_specs,
        out_specs=pl.BlockSpec((bt, out_pad), lambda i: (i, 0)),
        compiler_params=pltpu.CompilerParams(
            dimension_semantics=("parallel",),   # megacore split on v7x
            vmem_limit_bytes=vmem_limit),
    )(*flat_args)

    # TODO(synk): for latency-critical consumers, return the padded (b_pad, out_pad)
    # block (optionally bf16) and slice lazily at the consumer instead.
    return out[:B, :action_dim]


def init_actor_params(key, state_dim, action_dim, hidden1):
    """Deterministic init mimicking PyTorch nn.Linear (uniform +/- 1/sqrt(fan_in))."""
    dims = [state_dim, hidden1[0], hidden1[1], hidden1[2], action_dim]
    params = []
    for i in range(4):
        fan_in, fan_out = dims[i], dims[i + 1]
        key, kw, kb = jax.random.split(key, 3)
        bound = 1.0 / jnp.sqrt(fan_in)
        w = jax.random.uniform(kw, (fan_in, fan_out), jnp.float32, -bound, bound)
        b = jax.random.uniform(kb, (1, fan_out), jnp.float32, -bound, bound)
        params.append((w, b))
    return params


def actor_reference(state, params):
    h = state
    for i, (w, b) in enumerate(params):
        h = h @ w + b
        h = jnp.maximum(h, 0.0) if i < 3 else jnp.tanh(h)
    return h


if __name__ == "__main__":
    key = jax.random.PRNGKey(0)
    B, state_dim, action_dim = 2, 16, 8
    hidden1 = (32, 32, 32)

    key, k_state, k_big = jax.random.split(key, 3)
    state = jax.random.normal(k_state, (B, state_dim), jnp.float32)
    params = init_actor_params(key, state_dim, action_dim, hidden1)
    ref = actor_reference(state, params)

    # 1) f32 compute path: bit-accurate vs reference.
    pp_f32, adim = prepare_actor_params(params, compute_dtype=jnp.float32)
    out_f32 = actor_forward(state, pp_f32, action_dim=adim)
    jax.block_until_ready(out_f32)
    assert out_f32.shape == (B, action_dim)
    assert jnp.allclose(out_f32, ref, atol=1e-5, rtol=1e-5)

    # 2) default bf16-MXU / f32-accumulate path (loose tolerance vs f32 ref).
    pp_bf16, adim = prepare_actor_params(params)  # pad/cast once, reuse every call
    out_bf16 = actor_forward(state, pp_bf16, action_dim=adim)
    jax.block_until_ready(out_bf16)
    assert jnp.allclose(out_bf16, ref, atol=3e-2, rtol=3e-2)

    # 3) large batch exercising the multi-tile grid (>=2 steps) + remainder padding.
    big_B = 1000
    big_state = jax.random.normal(k_big, (big_B, state_dim), jnp.float32)
    out_big = actor_forward(big_state, pp_bf16, action_dim=adim)
    jax.block_until_ready(out_big)
    ref_big = actor_reference(big_state, params)
    assert out_big.shape == (big_B, action_dim)
    assert jnp.allclose(out_big, ref_big, atol=3e-2, rtol=3e-2)

    print("KERNEL_OK")
</pallas_src>

<mosaic_0001>
module attributes {stable_mosaic.version = 11 : i64} {
  func.func @actor_kernel(%arg0: i32, %arg1: memref<8x16xf32, #tpu.memory_space<vmem>>, %arg2: memref<16x128xf32, #tpu.memory_space<vmem>>, %arg3: memref<1x128xf32, #tpu.memory_space<vmem>>, %arg4: memref<128x128xf32, #tpu.memory_space<vmem>>, %arg5: memref<1x128xf32, #tpu.memory_space<vmem>>, %arg6: memref<128x128xf32, #tpu.memory_space<vmem>>, %arg7: memref<1x128xf32, #tpu.memory_space<vmem>>, %arg8: memref<128x128xf32, #tpu.memory_space<vmem>>, %arg9: memref<1x128xf32, #tpu.memory_space<vmem>>, %arg10: memref<8x128xf32, #tpu.memory_space<vmem>>) attributes {dimension_semantics = [#tpu.dimension_semantics<parallel>], iteration_bounds = array<i64: 1>, scalar_prefetch = 0 : i64, scratch_operands = 0 : i64, tpu.core_type = #tpu.core_type<tc>, window_params = [{transform_indices = @transform_0, window_bounds = array<i64: 8, 16>}, {pipeline_mode = #tpu.pipeline_mode<synchronous>, transform_indices = @transform_1, window_bounds = array<i64: 16, 128>}, {pipeline_mode = #tpu.pipeline_mode<synchronous>, transform_indices = @transform_2, window_bounds = array<i64: 1, 128>}, {pipeline_mode = #tpu.pipeline_mode<synchronous>, transform_indices = @transform_3, window_bounds = array<i64: 128, 128>}, {pipeline_mode = #tpu.pipeline_mode<synchronous>, transform_indices = @transform_4, window_bounds = array<i64: 1, 128>}, {pipeline_mode = #tpu.pipeline_mode<synchronous>, transform_indices = @transform_5, window_bounds = array<i64: 128, 128>}, {pipeline_mode = #tpu.pipeline_mode<synchronous>, transform_indices = @transform_6, window_bounds = array<i64: 1, 128>}, {pipeline_mode = #tpu.pipeline_mode<synchronous>, transform_indices = @transform_7, window_bounds = array<i64: 128, 128>}, {pipeline_mode = #tpu.pipeline_mode<synchronous>, transform_indices = @transform_8, window_bounds = array<i64: 1, 128>}, {transform_indices = @transform_9, window_bounds = array<i64: 8, 128>}]} {
    %c0 = arith.constant 0 : index
    %c0_0 = arith.constant 0 : index
    %0 = vector.load %arg1[%c0, %c0_0] : memref<8x16xf32, #tpu.memory_space<vmem>>, vector<8x16xf32>
    %c0_1 = arith.constant 0 : index
    %c0_2 = arith.constant 0 : index
    %1 = vector.load %arg2[%c0_1, %c0_2] : memref<16x128xf32, #tpu.memory_space<vmem>>, vector<16x128xf32>
    %cst = arith.constant dense<0.000000e+00> : vector<8x128xf32>
    %2 = tpu.matmul %0, %1, %cst {dimension_numbers = #tpu.dot_dimension_numbers<[1], [0], [0], [1], [0, 0, 1, 1], [], []>} : vector<8x16xf32>, vector<16x128xf32>, vector<8x128xf32> -> vector<8x128xf32>
    %c0_3 = arith.constant 0 : index
    %c0_4 = arith.constant 0 : index
    %3 = vector.load %arg3[%c0_3, %c0_4] : memref<1x128xf32, #tpu.memory_space<vmem>>, vector<1x128xf32>
    %4 = vector.broadcast %3 : vector<1x128xf32> to vector<8x128xf32>
    %5 = arith.addf %2, %4 : vector<8x128xf32>
    %cst_5 = arith.constant 0.000000e+00 : f32
    %6 = vector.broadcast %cst_5 : f32 to vector<8x128xf32>
    %7 = arith.maximumf %5, %6 : vector<8x128xf32>
    %c0_6 = arith.constant 0 : index
    %c0_7 = arith.constant 0 : index
    %8 = vector.load %arg4[%c0_6, %c0_7] : memref<128x128xf32, #tpu.memory_space<vmem>>, vector<128x128xf32>
    %cst_8 = arith.constant dense<0.000000e+00> : vector<8x128xf32>
    %9 = tpu.matmul %7, %8, %cst_8 {dimension_numbers = #tpu.dot_dimension_numbers<[1], [0], [0], [1], [0, 0, 1, 1], [], []>} : vector<8x128xf32>, vector<128x128xf32>, vector<8x128xf32> -> vector<8x128xf32>
    %c0_9 = arith.constant 0 : index
    %c0_10 = arith.constant 0 : index
    %10 = vector.load %arg5[%c0_9, %c0_10] : memref<1x128xf32, #tpu.memory_space<vmem>>, vector<1x128xf32>
    %11 = vector.broadcast %10 : vector<1x128xf32> to vector<8x128xf32>
    %12 = arith.addf %9, %11 : vector<8x128xf32>
    %cst_11 = arith.constant 0.000000e+00 : f32
    %13 = vector.broadcast %cst_11 : f32 to vector<8x128xf32>
    %14 = arith.maximumf %12, %13 : vector<8x128xf32>
    %c0_12 = arith.constant 0 : index
    %c0_13 = arith.constant 0 : index
    %15 = vector.load %arg6[%c0_12, %c0_13] : memref<128x128xf32, #tpu.memory_space<vmem>>, vector<128x128xf32>
    %cst_14 = arith.constant dense<0.000000e+00> : vector<8x128xf32>
    %16 = tpu.matmul %14, %15, %cst_14 {dimension_numbers = #tpu.dot_dimension_numbers<[1], [0], [0], [1], [0, 0, 1, 1], [], []>} : vector<8x128xf32>, vector<128x128xf32>, vector<8x128xf32> -> vector<8x128xf32>
    %c0_15 = arith.constant 0 : index
    %c0_16 = arith.constant 0 : index
    %17 = vector.load %arg7[%c0_15, %c0_16] : memref<1x128xf32, #tpu.memory_space<vmem>>, vector<1x128xf32>
    %18 = vector.broadcast %17 : vector<1x128xf32> to vector<8x128xf32>
    %19 = arith.addf %16, %18 : vector<8x128xf32>
    %cst_17 = arith.constant 0.000000e+00 : f32
    %20 = vector.broadcast %cst_17 : f32 to vector<8x128xf32>
    %21 = arith.maximumf %19, %20 : vector<8x128xf32>
    %c0_18 = arith.constant 0 : index
    %c0_19 = arith.constant 0 : index
    %22 = vector.load %arg8[%c0_18, %c0_19] : memref<128x128xf32, #tpu.memory_space<vmem>>, vector<128x128xf32>
    %cst_20 = arith.constant dense<0.000000e+00> : vector<8x128xf32>
    %23 = tpu.matmul %21, %22, %cst_20 {dimension_numbers = #tpu.dot_dimension_numbers<[1], [0], [0], [1], [0, 0, 1, 1], [], []>} : vector<8x128xf32>, vector<128x128xf32>, vector<8x128xf32> -> vector<8x128xf32>
    %c0_21 = arith.constant 0 : index
    %c0_22 = arith.constant 0 : index
    %24 = vector.load %arg9[%c0_21, %c0_22] : memref<1x128xf32, #tpu.memory_space<vmem>>, vector<1x128xf32>
    %25 = vector.broadcast %24 : vector<1x128xf32> to vector<8x128xf32>
    %26 = arith.addf %23, %25 : vector<8x128xf32>
    %27 = math.tanh %26 : vector<8x128xf32>
    %c0_23 = arith.constant 0 : index
    %c0_24 = arith.constant 0 : index
    %28 = vector.load %arg10[%c0_23, %c0_24] : memref<8x128xf32, #tpu.memory_space<vmem>>, vector<8x128xf32>
    tpu.vector_store %arg10[%c0_23, %c0_24], %27 {strides = array<i32>} : memref<8x128xf32, #tpu.memory_space<vmem>>, vector<8x128xf32>,
    return
  }
  func.func @transform_0(%arg0: i32) -> (i32, i32) {
    %c0_i32 = arith.constant 0 : i32
    %c0_i32_0 = arith.constant 0 : i32
    return %arg0, %c0_i32 : i32, i32
  }
  func.func @transform_1(%arg0: i32) -> (i32, i32) {
    %c0_i32 = arith.constant 0 : i32
    %c0_i32_0 = arith.constant 0 : i32
    %c0_i32_1 = arith.constant 0 : i32
    return %c0_i32, %c0_i32_0 : i32, i32
  }
  func.func @transform_2(%arg0: i32) -> (i32, i32) {
    %c0_i32 = arith.constant 0 : i32
    %c0_i32_0 = arith.constant 0 : i32
    %c0_i32_1 = arith.constant 0 : i32
    return %c0_i32, %c0_i32_0 : i32, i32
  }
  func.func @transform_3(%arg0: i32) -> (i32, i32) {
    %c0_i32 = arith.constant 0 : i32
    %c0_i32_0 = arith.constant 0 : i32
    %c0_i32_1 = arith.constant 0 : i32
    return %c0_i32, %c0_i32_0 : i32, i32
  }
  func.func @transform_4(%arg0: i32) -> (i32, i32) {
    %c0_i32 = arith.constant 0 : i32
    %c0_i32_0 = arith.constant 0 : i32
    %c0_i32_1 = arith.constant 0 : i32
    return %c0_i32, %c0_i32_0 : i32, i32
  }
  func.func @transform_5(%arg0: i32) -> (i32, i32) {
    %c0_i32 = arith.constant 0 : i32
    %c0_i32_0 = arith.constant 0 : i32
    %c0_i32_1 = arith.constant 0 : i32
    return %c0_i32, %c0_i32_0 : i32, i32
  }
  func.func @transform_6(%arg0: i32) -> (i32, i32) {
    %c0_i32 = arith.constant 0 : i32
    %c0_i32_0 = arith.constant 0 : i32
    %c0_i32_1 = arith.constant 0 : i32
    return %c0_i32, %c0_i32_0 : i32, i32
  }
  func.func @transform_7(%arg0: i32) -> (i32, i32) {
    %c0_i32 = arith.constant 0 : i32
    %c0_i32_0 = arith.constant 0 : i32
    %c0_i32_1 = arith.constant 0 : i32
    return %c0_i32, %c0_i32_0 : i32, i32
  }
  func.func @transform_8(%arg0: i32) -> (i32, i32) {
    %c0_i32 = arith.constant 0 : i32
    %c0_i32_0 = arith.constant 0 : i32
    %c0_i32_1 = arith.constant 0 : i32
    return %c0_i32, %c0_i32_0 : i32, i32
  }
  func.func @transform_9(%arg0: i32) -> (i32, i32) {
    %c0_i32 = arith.constant 0 : i32
    %c0_i32_0 = arith.constant 0 : i32
    return %arg0, %c0_i32 : i32, i32
  }
}

</mosaic_0001>

<bundles_post_ra>
// kernel: actor_forward.1
= control target key start
LH: loop header
LB: loop body
LE: loop exit
PB: predicated region body
PF: predicated region fallthrough
CT: control target
= control target key end

     0   :  { %14 = vsyncpa [#allocation3], 0  ;;  %s997_s0 = inlined_call_operand.vmem [shape: f32[8,16], index: 0, kind: input, shape index: {}]   ;;  %s998_s1 = inlined_call_operand.hbm [shape: f32[16,128], index: 1, kind: input, shape index: {}]   ;;  %s999_s2 = inlined_call_operand.vmem [shape: f32[1,128], index: 2, kind: input, shape index: {}]   ;;  %s1000_s3 = inlined_call_operand.hbm [shape: f32[128,128], index: 3, kind: input, shape index: {}]   ;;  %s1001_s4 = inlined_call_operand.vmem [shape: f32[1,128], index: 4, kind: input, shape index: {}]   ;;  %s1002_s5 = inlined_call_operand.hbm [shape: f32[128,128], index: 5, kind: input, shape index: {}]   ;;  %s1003_s6 = inlined_call_operand.vmem [shape: f32[1,128], index: 6, kind: input, shape index: {}]   ;;  %s1004_s7 = inlined_call_operand.hbm [shape: f32[128,128], index: 7, kind: input, shape index: {}]   ;;  %s1005_s8 = inlined_call_operand.vmem [shape: f32[1,128], index: 8, kind: input, shape index: {}]   ;;  %s1006_s9 = inlined_call_operand.vmem [shape: f32[8,128], index: 9, kind: output, shape index: {}]  }
   0x1   :  { %15 = vsyncpa [#allocation5], 0 }
   0x2   :  { %16 = vsyncpa [#allocation8], 0  ;;  %s813_s30 = smov [#allocation4]   ;;  %s814_s11 = smov [#allocation2]  }
   0x3   :  { %s38_s10 = sshll.u32 %s813_s30, 4  ;;  %s24_s12 = sshll.u32 %s814_s11, 4  ;;  %s39_s10 = int_to_ptr.vmem [resolvable:$true] %s38_s10  ;;  %s872_s12 = int_to_ptr.vmem [resolvable:$true] %s24_s12 }
   0x4   :  { %s719_s15 = scalar_lea.hbm %s1000_s3, 2048 }
   0x5   :  { %p720_p0 = scmp.ne.s32.totalorder %s1000_s3, %s719_s15  ;;  %p723_p1 = scmp.lt.u32.totalorder %s719_s15, %s1000_s3 }
   0x7   :  { %p725_p2 = pnand %p723_p1, %p720_p0 }
   0x9   :  { %728 = shalt.err (!%p725_p2)
}
   0xa   :  { %s729_s20 = scalar_lea.vmem %s39_s10, 2048  ;;  %p734_p4 = scmp.lt.s32.totalorder %s39_s10, %s39_s10 }
   0xb   :  { %p730_p3 = scmp.ne.s32.totalorder %s39_s10, %s729_s20  ;;  %p735_p5 = scmp.lt.s32.totalorder %s729_s20, %s729_s20 }
   0xd   :  { %p736_p6 = por %p735_p5, %p734_p4 }
   0xf   :  { %p737_p7 = pnand %p736_p6, %p730_p3 }
  0x11   :  { %740 = shalt.err (!%p737_p7)
}
  0x12   :  { %s815_s21 = smov 128   ;;  %s816_s22 = smov 8  }
  0x13   :  { %44 = dma.hbm_to_vmem [thread:$0]  %s1000_s3, 2048, %s39_s10, [#allocation5], %s815_s21, %s815_s21, %s816_s22  }
  0x14   :  { %s741_s27 = scalar_lea.hbm %s998_s1, 256 }
  0x15   :  { %p742_p8 = scmp.ne.s32.totalorder %s998_s1, %s741_s27  ;;  %p745_p9 = scmp.lt.u32.totalorder %s741_s27, %s998_s1 }
  0x17   :  { %p747_p10 = pnand %p745_p9, %p742_p8 }
  0x19   :  { %750 = shalt.err (!%p747_p10)
}
  0x1a   :  { %s751_s13 = scalar_lea.vmem %s872_s12, 256  ;;  %p756_p12 = scmp.lt.s32.totalorder %s872_s12, %s872_s12 }
  0x1b   :  { %p752_p11 = scmp.ne.s32.totalorder %s872_s12, %s751_s13  ;;  %p757_p13 = scmp.lt.s32.totalorder %s751_s13, %s751_s13 }
  0x1d   :  { %p758_p0 = por %p757_p13, %p756_p12 }
  0x1f   :  { %p759_p1 = pnand %p758_p0, %p752_p11 }
  0x21   :  { %762 = shalt.err (!%p759_p1)
}
  0x22   :  { %30 = dma.hbm_to_vmem [thread:$0]  %s998_s1, 256, %s872_s12, [#allocation3], %s815_s21, %s815_s21, %s816_s22  }
  0x23   :  { %s817_s14 = smov [#allocation6]   ;;  %s818_s16 = smov [#allocation7]  }
  0x24   :  { %s52_s15 = sshll.u32 %s817_s14, 4  ;;  %s66_s17 = sshll.u32 %s818_s16, 4  ;;  %s53_s15 = int_to_ptr.vmem [resolvable:$true] %s52_s15  ;;  %s909_s17 = int_to_ptr.vmem [resolvable:$true] %s66_s17 }
  0x25   :  { %s763_s20 = scalar_lea.hbm %s1002_s5, 2048 }
  0x26   :  { %p764_p2 = scmp.ne.s32.totalorder %s1002_s5, %s763_s20  ;;  %p767_p3 = scmp.lt.u32.totalorder %s763_s20, %s1002_s5 }
  0x28   :  { %p769_p4 = pnand %p767_p3, %p764_p2 }
  0x2a   :  { %772 = shalt.err (!%p769_p4)
}
  0x2b   :  { %s773_s1 = scalar_lea.vmem %s53_s15, 2048  ;;  %p778_p6 = scmp.lt.s32.totalorder %s53_s15, %s53_s15 }
  0x2c   :  { %p774_p5 = scmp.ne.s32.totalorder %s53_s15, %s773_s1  ;;  %p779_p7 = scmp.lt.s32.totalorder %s773_s1, %s773_s1 }
  0x2e   :  { %p780_p8 = por %p779_p7, %p778_p6 }
  0x30   :  { %p781_p9 = pnand %p780_p8, %p774_p5 }
  0x32   :  { %784 = shalt.err (!%p781_p9)
}
  0x33   :  { %58 = dma.hbm_to_vmem [thread:$0]  %s1002_s5, 2048, %s53_s15, [#allocation5], %s815_s21, %s815_s21, %s816_s22  }
  0x34   :  { %s785_s30 = scalar_lea.hbm %s1004_s7, 2048 }
  0x35   :  { %p786_p10 = scmp.ne.s32.totalorder %s1004_s7, %s785_s30  ;;  %p789_p11 = scmp.lt.u32.totalorder %s785_s30, %s1004_s7 }
  0x37   :  { %p791_p12 = pnand %p789_p11, %p786_p10 }
  0x39   :  { %794 = shalt.err (!%p791_p12)
}
  0x3a   :  { %s795_s14 = scalar_lea.vmem %s909_s17, 2048  ;;  %p800_p0 = scmp.lt.s32.totalorder %s909_s17, %s909_s17 }
  0x3b   :  { %p796_p13 = scmp.ne.s32.totalorder %s909_s17, %s795_s14  ;;  %p801_p1 = scmp.lt.s32.totalorder %s795_s14, %s795_s14 }
  0x3d   :  { %p802_p2 = por %p801_p1, %p800_p0 }
  0x3f   :  { %p803_p3 = pnand %p802_p2, %p796_p13 }
  0x41   :  { %806 = shalt.err (!%p803_p3)
}
  0x42   :  { %72 = dma.hbm_to_vmem [thread:$0]  %s1004_s7, 2048, %s909_s17, [#allocation8], %s815_s21, %s815_s21, %s816_s22  }
  0x43   :  { %807 = dma.done.wait [#allocation3], 256  }
  0x44   :  { %808 = vsyncadd [#allocation3], 4294967040 }
  0x45   :  { %809 = dma.done.wait [#allocation5], 4096  }
  0x46   :  { %810 = vsyncadd [#allocation5], 4294963200 }
  0x47   :  { %811 = dma.done.wait [#allocation8], 2048  }
  0x48   :  { %812 = vsyncadd [#allocation8], 4294965248  ;;  %v819_v0 = vmov 0.0|0.0   ;;  %vm820_vm0 = vmmov 0   ;;  %v821_v1 = vmov 0.0   ;;  %v88_v2 = vld [vmem:[#allocation2] sm:$0xff] }
  0x49   :  { %633 = vmatprep.subr.bf16.mxu0 %v819_v0  ;;  %525 = vmatprep.mubr.msk.f32.mxu0 %vm820_vm0, %v821_v1  ;;  %v89_v3 = vld [vmem:[#allocation2 + $0x8] sm:$0xff]  ;;  %v172_v5 = vld [vmem:[#allocation4] sm:$0xff]  ;;  %v173_v6 = vld [vmem:[#allocation4 + $0x8] sm:$0xff]  ;;  %vm97_vm1 = vcmask 130048  }
  0x4a   :  { %636 = vmatprep.subr.bf16.mxu1 %v819_v0  ;;  %560 = vmatprep.mubr.msk.f32.mxu1 %vm820_vm0, %v821_v1  ;;  %v634_v4 = vpack.c.bf16 %v89_v3, %v88_v2  ;;  %v174_v7 = vld [vmem:[#allocation4 + $0x10] sm:$0xff]  ;;  %v637_v8 = vpack.c.bf16 %v173_v6, %v172_v5  ;;  %v175_v9 = vld [vmem:[#allocation4 + $0x18] sm:$0xff]  ;;  %v176_v12 = vld [vmem:[#allocation4 + $0x20] sm:$0xff] }
  0x4b   :  { %v87_v10 = vld [vmem:[%s997_s0] sm:$0xff]  ;;  %v640_v11 = vpack.c.bf16 %v175_v9, %v174_v7  ;;  %v177_v13 = vld [vmem:[#allocation4 + $0x28] sm:$0xff]  ;;  %v179_v16 = vld [vmem:[#allocation4 + $0x38] sm:$0xff] }
  0x4c   :  { %635 = vmatpush3.bf16.msra.mxu0 %v634_v4  ;;  %638 = vmatpush3.bf16.msra.mxu1 %v637_v8  ;;  %v643_v14 = vpack.c.bf16 %v177_v13, %v176_v12  ;;  %v178_v15 = vld [vmem:[#allocation4 + $0x30] sm:$0xff]  ;;  %v180_v18 = vld [vmem:[#allocation4 + $0x40] sm:$0xff]  ;;  %v181_v19 = vld [vmem:[#allocation4 + $0x48] sm:$0xff] }
  0x4d   :  { %660 = vmatprep.subr.bf16.mxu0 %v819_v0  ;;  %639 = vmatprep.subr.bf16.mxu1 %v819_v0  ;;  %v646_v17 = vpack.c.bf16 %v179_v16, %v178_v15  ;;  %v649_v20 = vpack.c.bf16 %v181_v19, %v180_v18  ;;  %v182_v21 = vld [vmem:[#allocation4 + $0x50] sm:$0xff]  ;;  %v183_v22 = vld [vmem:[#allocation4 + $0x58] sm:$0xff]  ;;  %v184_v24 = vld [vmem:[#allocation4 + $0x60] sm:$0xff] }
  0x4e   :  { %v652_v23 = vpack.c.bf16 %v183_v22, %v182_v21  ;;  %v185_v25 = vld [vmem:[#allocation4 + $0x68] sm:$0xff]  ;;  %v186_v27 = vld [vmem:[#allocation4 + $0x70] sm:$0xff]  ;;  %v187_v28 = vld [vmem:[#allocation4 + $0x78] sm:$0xff] }
  0x4f   :  { %526 = vmatmul.mubr.msk.f32.vlgmr.msra.gmra.mrb[0].mxu0 %vm97_vm1, %v87_v10  ;;  %v655_v26 = vpack.c.bf16 %v185_v25, %v184_v24  ;;  %v658_v29 = vpack.c.bf16 %v187_v28, %v186_v27  ;;  %v266_v30 = vld [vmem:[#allocation6] sm:$0xff]  ;;  %v267_v31 = vld [vmem:[#allocation6 + $0x8] sm:$0xff]  ;;  %v268_v32 = vld [vmem:[#allocation6 + $0x10] sm:$0xff] }
  0x50   :  { %595 = vmatprep.mubr.msk.f32.mxu0 %vm820_vm0, %v821_v1  ;;  %641 = vmatpush3.bf16.msra.mxu1 %v640_v11  ;;  %v661_v33 = vpack.c.bf16 %v267_v31, %v266_v30  ;;  %v269_v34 = vld [vmem:[#allocation6 + $0x18] sm:$0xff]  ;;  %v270_v36 = vld [vmem:[#allocation6 + $0x20] sm:$0xff]  ;;  %v271_v37 = vld [vmem:[#allocation6 + $0x28] sm:$0xff] }
  0x51   :  { %642 = vmatprep.subr.bf16.mxu1 %v819_v0  ;;  %v664_v35 = vpack.c.bf16 %v269_v34, %v268_v32  ;;  %v667_v38 = vpack.c.bf16 %v271_v37, %v270_v36  ;;  %v272_v39 = vld [vmem:[#allocation6 + $0x30] sm:$0xff]  ;;  %v273_v40 = vld [vmem:[#allocation6 + $0x38] sm:$0xff]  ;;  %v274_v42 = vld [vmem:[#allocation6 + $0x40] sm:$0xff] }
  0x52   :  { %662 = vmatpush3.bf16.msra.mxu0 %v661_v33  ;;  %v670_v41 = vpack.c.bf16 %v273_v40, %v272_v39  ;;  %v275_v43 = vld [vmem:[#allocation6 + $0x48] sm:$0xff]  ;;  %v276_v45 = vld [vmem:[#allocation6 + $0x50] sm:$0xff]  ;;  %v277_v46 = vld [vmem:[#allocation6 + $0x58] sm:$0xff] }
  0x53   :  { %663 = vmatprep.subr.bf16.mxu0 %v819_v0  ;;  %v673_v44 = vpack.c.bf16 %v275_v43, %v274_v42  ;;  %v676_v47 = vpack.c.bf16 %v277_v46, %v276_v45  ;;  %v278_v48 = vld [vmem:[#allocation6 + $0x60] sm:$0xff]  ;;  %v279_v49 = vld [vmem:[#allocation6 + $0x68] sm:$0xff]  ;;  %v462_v51 = vld [vmem:[%s999_s2] ss:$0 sm:$0xff] }
  0x54   :  { %644 = vmatpush3.bf16.msra.mxu1 %v643_v14  ;;  %v679_v50 = vpack.c.bf16 %v279_v49, %v278_v48  ;;  %v280_v56 = vld [vmem:[#allocation6 + $0x70] sm:$0xff]  ;;  %v281_v57 = vld [vmem:[#allocation6 + $0x78] sm:$0xff]  ;;  %v360_v59 = vld [vmem:[#allocation7] sm:$0xff] }
  0x55   :  { %645 = vmatprep.subr.bf16.mxu1 %v819_v0  ;;  %v682_v58 = vpack.c.bf16 %v281_v57, %v280_v56  ;;  %v361_v60 = vld [vmem:[#allocation7 + $0x8] sm:$0xff]  ;;  %v362_v61 = vld [vmem:[#allocation7 + $0x10] sm:$0xff]  ;;  %v363_v63 = vld [vmem:[#allocation7 + $0x18] sm:$0xff] }
  0x56   :  { %665 = vmatpush3.bf16.msra.mxu0 %v664_v35  ;;  %v685_v62 = vpack.c.bf16 %v361_v60, %v360_v59  ;;  %v688_v2 = vpack.c.bf16 %v363_v63, %v362_v61  ;;  %v364_v3 = vld [vmem:[#allocation7 + $0x20] sm:$0xff]  ;;  %v365_v4 = vld [vmem:[#allocation7 + $0x28] sm:$0xff]  ;;  %v367_v6 = vld [vmem:[#allocation7 + $0x38] sm:$0xff] }
  0x57   :  { %666 = vmatprep.subr.bf16.mxu0 %v819_v0  ;;  %v691_v5 = vpack.c.bf16 %v365_v4, %v364_v3  ;;  %v368_v8 = vld [vmem:[#allocation7 + $0x40] sm:$0xff]  ;;  %v369_v9 = vld [vmem:[#allocation7 + $0x48] sm:$0xff]  ;;  %v370_v11 = vld [vmem:[#allocation7 + $0x50] sm:$0xff] }
  0x58   :  { %647 = vmatpush3.bf16.msra.mxu1 %v646_v17  ;;  %v697_v10 = vpack.c.bf16 %v369_v9, %v368_v8  ;;  %v371_v12 = vld [vmem:[#allocation7 + $0x58] sm:$0xff]  ;;  %v372_v14 = vld [vmem:[#allocation7 + $0x60] sm:$0xff]  ;;  %v373_v15 = vld [vmem:[#allocation7 + $0x68] sm:$0xff] }
  0x59   :  { %648 = vmatprep.subr.bf16.mxu1 %v819_v0  ;;  %v700_v13 = vpack.c.bf16 %v371_v12, %v370_v11  ;;  %v703_v16 = vpack.c.bf16 %v373_v15, %v372_v14  ;;  %v464_v17 = vld [vmem:[%s1001_s4] ss:$0 sm:$0xff] }
  0x5a   :  { %668 = vmatpush3.bf16.msra.mxu0 %v667_v38  ;;  %v374_v22 = vld [vmem:[#allocation7 + $0x70] sm:$0xff] }
  0x5b   :  { %669 = vmatprep.subr.bf16.mxu0 %v819_v0  ;;  %v465_v25 = vld [vmem:[%s1003_s6] ss:$0 sm:$0xff] }
  0x5c   :  { %650 = vmatpush3.bf16.msra.mxu1 %v649_v20 }
  0x5d   :  { %651 = vmatprep.subr.bf16.mxu1 %v819_v0 }
  0x5e   :  { %671 = vmatpush3.bf16.msra.mxu0 %v670_v41 }
  0x5f   :  { %672 = vmatprep.subr.bf16.mxu0 %v819_v0 }
  0x60   :  { %653 = vmatpush3.bf16.msra.mxu1 %v652_v23  ;;  %v375_v23 = vld [vmem:[#allocation7 + $0x78] sm:$0xff] }
  0x61   :  { %654 = vmatprep.subr.bf16.mxu1 %v819_v0  ;;  %v706_v24 = vpack.c.bf16 %v375_v23, %v374_v22 }
  0x62   :  { %674 = vmatpush3.bf16.msra.mxu0 %v673_v44 }
  0x63   :  { %675 = vmatprep.subr.bf16.mxu0 %v819_v0 }
  0x64   :  { %656 = vmatpush3.bf16.msra.mxu1 %v655_v26 }
  0x65   :  { %657 = vmatprep.subr.bf16.mxu1 %v819_v0 }
  0x66   :  { %677 = vmatpush3.bf16.msra.mxu0 %v676_v47 }
  0x67   :  { %678 = vmatprep.subr.bf16.mxu0 %v819_v0 }
  0x68   :  { %659 = vmatpush3.bf16.msra.mxu1 %v658_v29  ;;  %v466_v29 = vld [vmem:[%s1005_s8] ss:$0 sm:$0xff] }
  0x69   :  { %684 = vmatprep.subr.bf16.mxu1 %v819_v0 }
  0x6a   :  { %680 = vmatpush3.bf16.msra.mxu0 %v679_v50 }
  0x6b   :  { %681 = vmatprep.subr.bf16.mxu0 %v819_v0 }
  0x6e   :  { %683 = vmatpush3.bf16.msra.mxu0 %v682_v58 }
 0x122   :  { %v167_v52 = vpop.f32.mrb[0].mxu0 }
 0x123   :  { %v168_v53 = vadd.f32 %v462_v51, %v167_v52  ;;  %v527_v54 = vpop.f32.mrb[1].mxu0 }
 0x125   :  { %v171_v55 = vmax.f32 %v168_v53, 0.0 }
 0x127   :  { %561 = vmatmul.mubr.f32.vlgmr.msra.gmra.mrb[0].mxu1 %v171_v55 }
 0x128   :  { %630 = vmatprep.mubr.msk.f32.mxu1 %vm820_vm0, %v821_v1  ;;  %686 = vmatpush3.bf16.msra.mxu1 %v685_v62  ;;  %v366_v1 = vld [vmem:[#allocation7 + $0x30] sm:$0xff] }
 0x129   :  { %687 = vmatprep.subr.bf16.mxu1 %v819_v0  ;;  %v694_v7 = vpack.c.bf16 %v367_v6, %v366_v1 }
 0x12c   :  { %689 = vmatpush3.bf16.msra.mxu1 %v688_v2 }
 0x12d   :  { %690 = vmatprep.subr.bf16.mxu1 %v819_v0 }
 0x130   :  { %692 = vmatpush3.bf16.msra.mxu1 %v691_v5 }
 0x131   :  { %693 = vmatprep.subr.bf16.mxu1 %v819_v0 }
 0x134   :  { %695 = vmatpush3.bf16.msra.mxu1 %v694_v7 }
 0x135   :  { %696 = vmatprep.subr.bf16.mxu1 %v819_v0 }
 0x138   :  { %698 = vmatpush3.bf16.msra.mxu1 %v697_v10 }
 0x139   :  { %699 = vmatprep.subr.bf16.mxu1 %v819_v0 }
 0x13c   :  { %701 = vmatpush3.bf16.msra.mxu1 %v700_v13 }
 0x13d   :  { %702 = vmatprep.subr.bf16.mxu1 %v819_v0 }
 0x140   :  { %704 = vmatpush3.bf16.msra.mxu1 %v703_v16 }
 0x141   :  { %705 = vmatprep.subr.bf16.mxu1 %v819_v0 }
 0x144   :  { %707 = vmatpush3.bf16.msra.mxu1 %v706_v24 }
 0x1fa   :  { %v261_v18 = vpop.f32.mrb[0].mxu1 }
 0x1fb   :  { %v262_v19 = vadd.f32 %v464_v17, %v261_v18  ;;  %v562_v20 = vpop.f32.mrb[1].mxu1 }
 0x1fd   :  { %v265_v21 = vmax.f32 %v262_v19, 0.0 }
 0x1ff   :  { %596 = vmatmul.mubr.f32.vlgmr.msra.gmra.mrb[2].mxu0 %v265_v21 }
 0x2d2   :  { %v355_v26 = vpop.f32.mrb[2].mxu0 }
 0x2d3   :  { %v356_v27 = vadd.f32 %v465_v25, %v355_v26  ;;  %v597_v0 = vpop.f32.mrb[3].mxu0 }
 0x2d5   :  { %v359_v28 = vmax.f32 %v356_v27, 0.0 }
 0x2d7   :  { %631 = vmatmul.mubr.f32.vlgmr.msra.gmra.mrb[2].mxu1 %v359_v28 }
 0x3aa   :  { %v449_v30 = vpop.f32.mrb[2].mxu1 }
 0x3ab   :  { %v450_v31 = vadd.f32 %v466_v29, %v449_v30  ;;  %v632_v32 = vpop.f32.mrb[3].mxu1 }
 0x3ad   :  { %717 = vtanh.f32 %v450_v31 }
 0x3b7   :  { %v718_v33 = vpop.eup %717 }
 0x3b8   :  { %454 = vst [vmem:[%s1006_s9] sm:$0xff] %v718_v33 }
 0x3b9   :  { %459 = vsyncpa [#allocation3], 1 }
 0x3ba   :  { %460 = vsyncpa [#allocation5], 1 }
 0x3bb   :  { %461 = vsyncpa [#allocation8], 1 }

</bundles_post_ra>
